<compile_context>
chip_gen: v7x
topology: tpu7x:2x2x1
jax: 0.10.0
libtpu: 0.0.40
codegen_flags: <defaults>
</compile_context>

<pallas_src>
import functools

import jax
import jax.numpy as jnp
from jax.experimental import pallas as pl
from jax.experimental.pallas import tpu as pltpu

_LANE = 128
_BN_EPS = 1e-5


def _make_fc_kernel(has_dropout, keep_threshold_i32, inv_keep, use_bn, activation):
    def kernel(*refs):
        if has_dropout:
            x_ref, w_ref, b_ref, g_ref, bt_ref, bits_ref, o_ref = refs
        else:
            x_ref, w_ref, b_ref, g_ref, bt_ref, o_ref = refs

        # Linear, consuming the PyTorch-layout (out, in) weight directly:
        # y[n, o] = sum_k x[n, k] * w[o, k]  + b[o]
        y = jax.lax.dot_general(
            x_ref[...], w_ref[...],
            dimension_numbers=(((1,), (1,)), ((), ())),
            preferred_element_type=jnp.float32)
        y = y + b_ref[...]

        if has_dropout:
            # bits are uniform random 32-bit words (bitcast to int32 in the wrapper).
            # P(drop) = p is enforced by the integer threshold; one signed compare per element.
            keep = bits_ref[...] >= jnp.int32(keep_threshold_i32)
            y = jnp.where(keep, y * jnp.float32(inv_keep), jnp.float32(0.0))

        if use_bn:
            # Training-mode batch statistics (biased variance), eps = 1e-5.
            mean = jnp.mean(y, axis=0, keepdims=True)
            var = jnp.mean((y - mean) ** 2, axis=0, keepdims=True)
            y = (y - mean) * jax.lax.rsqrt(var + _BN_EPS)
            y = y * g_ref[...] + bt_ref[...]

        if activation == "relu":
            y = jnp.maximum(y, 0.0)
        elif activation == "sigmoid":
            y = jax.nn.sigmoid(y)

        o_ref[...] = y.astype(o_ref.dtype)

    return kernel


def fc_forward(x, w, b, gamma=None, beta=None, *, dropout_p=None, use_bn=False,
               activation=None, dropout_key=None, tile_out=_LANE):
    """x: (N, in_features); w: PyTorch-layout (out_features, in_features); b: (out_features,)."""
    n, in_features = x.shape
    out_features, in_features_w = w.shape
    assert in_features_w == in_features

    # Lane-dense output: pad out_features up to a multiple of 128.
    # (In production, pad the parameters once at load time, not per call.)
    out_pad = ((out_features + _LANE - 1) // _LANE) * _LANE
    pad = out_pad - out_features

    w_p = jnp.pad(jnp.asarray(w), ((0, pad), (0, 0)))            # keep (out, in) layout
    b_p = jnp.pad(jnp.asarray(b), (0, pad)).reshape(1, out_pad)
    if gamma is None:
        gamma = jnp.ones((out_features,), x.dtype)
    if beta is None:
        beta = jnp.zeros((out_features,), x.dtype)
    g_p = jnp.pad(jnp.asarray(gamma), (0, pad)).reshape(1, out_pad)
    bt_p = jnp.pad(jnp.asarray(beta), (0, pad)).reshape(1, out_pad)

    tile_out = min(tile_out, out_pad)
    assert out_pad % tile_out == 0
    grid = (out_pad // tile_out,)

    in_specs = [
        pl.BlockSpec((n, in_features), lambda j: (0, 0)),           # x (resident across tiles)
        pl.BlockSpec((tile_out, in_features), lambda j: (j, 0)),    # W tile (out, in)
        pl.BlockSpec((1, tile_out), lambda j: (0, j)),              # bias
        pl.BlockSpec((1, tile_out), lambda j: (0, j)),              # gamma
        pl.BlockSpec((1, tile_out), lambda j: (0, j)),              # beta
    ]
    inputs = [x, w_p, b_p, g_p, bt_p]

    has_dropout = isinstance(dropout_p, float)
    if has_dropout:
        if dropout_key is None:
            dropout_key = jax.random.PRNGKey(0)
        # Per-element uniform 32-bit words, generated once (deterministic in the key) and
        # bitcast to int32 so the in-kernel keep test is a plain signed compare.
        # (Per-element bits also avoid the correlated-mask-across-tiles hazard.)
        bits = jax.random.bits(dropout_key, (n, out_pad), dtype=jnp.uint32)
        bits_i32 = jax.lax.bitcast_convert_type(bits, jnp.int32)
        in_specs.append(pl.BlockSpec((n, tile_out), lambda j: (0, j)))
        inputs.append(bits_i32)
        thr_u32 = min(int(round(dropout_p * (1 << 32))), (1 << 32) - 1)
        keep_threshold_i32 = thr_u32 - (1 << 31)      # signed threshold with the same measure
        inv_keep = 1.0 / (1.0 - dropout_p) if dropout_p < 1.0 else 0.0
    else:
        keep_threshold_i32 = 0
        inv_keep = 1.0

    kernel = _make_fc_kernel(has_dropout, keep_threshold_i32, inv_keep, use_bn, activation)

    out_padded = pl.pallas_call(
        kernel,
        grid=grid,
        in_specs=in_specs,
        out_specs=pl.BlockSpec((n, tile_out), lambda j: (0, j)),
        out_shape=jax.ShapeDtypeStruct((n, out_pad), x.dtype),
        compiler_params=pltpu.CompilerParams(
            dimension_semantics=("parallel",)),       # shard feature tiles across TCs (v7x)
    )(*inputs)

    # TODO(synk): for very large in_features add a trailing "arbitrary" K axis with a VMEM
    # f32 accumulator (pl.when init/finalize); N-tiling with BN needs a two-pass scheme.
    return out_padded[:, :out_features]


if __name__ == "__main__":
    key = jax.random.PRNGKey(0)
    k_x, k_w, k_b = jax.random.split(key, 3)

    N, IN, OUT = 8, 32, 64

    x = jax.random.normal(k_x, (N, IN), dtype=jnp.float32)

    # nn.Linear-style init: U(-1/sqrt(in), 1/sqrt(in))
    bound = 1.0 / (IN ** 0.5)
    w = jax.random.uniform(k_w, (OUT, IN), minval=-bound, maxval=bound, dtype=jnp.float32)
    b = jax.random.uniform(k_b, (OUT,), minval=-bound, maxval=bound, dtype=jnp.float32)
    gamma = jnp.ones((OUT,), dtype=jnp.float32)
    beta = jnp.zeros((OUT,), dtype=jnp.float32)

    # Config 1: FC(in, out, dropout=None, bn=True, activation='relu')
    y1 = fc_forward(x, w, b, gamma, beta, dropout_p=None, use_bn=True, activation="relu")
    jax.block_until_ready(y1)

    # Pure-JAX reference for config 1
    lin = x @ w.T + b
    mean = lin.mean(0, keepdims=True)
    var = ((lin - mean) ** 2).mean(0, keepdims=True)
    ref1 = jnp.maximum((lin - mean) * jax.lax.rsqrt(var + _BN_EPS) * gamma + beta, 0.0)
    assert y1.shape == (N, OUT)
    assert jnp.allclose(y1, ref1, rtol=1e-5, atol=1e-5)

    # Config 2: FC(in, out, dropout=0.5, bn=False, activation='sigmoid')
    drop_key = jax.random.PRNGKey(42)
    y2 = fc_forward(x, w, b, gamma, beta, dropout_p=0.5, use_bn=False,
                    activation="sigmoid", dropout_key=drop_key)
    jax.block_until_ready(y2)

    # Reference for config 2 (replicates the deterministic mask construction)
    out_pad = ((OUT + _LANE - 1) // _LANE) * _LANE
    bits = jax.random.bits(drop_key, (N, out_pad), dtype=jnp.uint32)
    bits_i32 = jax.lax.bitcast_convert_type(bits, jnp.int32)[:, :OUT]
    thr = int(round(0.5 * (1 << 32))) - (1 << 31)
    keep = bits_i32 >= jnp.int32(thr)
    ref2 = jax.nn.sigmoid(jnp.where(keep, lin * 2.0, 0.0))
    assert y2.shape == (N, OUT)
    assert jnp.allclose(y2, ref2, rtol=1e-5, atol=1e-5)

    print("KERNEL_OK")
</pallas_src>

<mosaic_0001>
module attributes {stable_mosaic.version = 11 : i64} {
  func.func @kernel(%arg0: i32, %arg1: memref<8x32xf32, #tpu.memory_space<vmem>>, %arg2: memref<128x32xf32, #tpu.memory_space<vmem>>, %arg3: memref<1x128xf32, #tpu.memory_space<vmem>>, %arg4: memref<1x128xf32, #tpu.memory_space<vmem>>, %arg5: memref<1x128xf32, #tpu.memory_space<vmem>>, %arg6: memref<8x128xf32, #tpu.memory_space<vmem>>) attributes {dimension_semantics = [#tpu.dimension_semantics<parallel>], iteration_bounds = array<i64: 1>, scalar_prefetch = 0 : i64, scratch_operands = 0 : i64, tpu.core_type = #tpu.core_type<tc>, window_params = [{pipeline_mode = #tpu.pipeline_mode<synchronous>, transform_indices = @transform_0, window_bounds = array<i64: 8, 32>}, {transform_indices = @transform_1, window_bounds = array<i64: 128, 32>}, {transform_indices = @transform_2, window_bounds = array<i64: 1, 128>}, {transform_indices = @transform_3, window_bounds = array<i64: 1, 128>}, {transform_indices = @transform_4, window_bounds = array<i64: 1, 128>}, {transform_indices = @transform_5, window_bounds = array<i64: 8, 128>}]} {
    %c0 = arith.constant 0 : index
    %c0_0 = arith.constant 0 : index
    %0 = vector.load %arg1[%c0, %c0_0] : memref<8x32xf32, #tpu.memory_space<vmem>>, vector<8x32xf32>
    %c0_1 = arith.constant 0 : index
    %c0_2 = arith.constant 0 : index
    %1 = vector.load %arg2[%c0_1, %c0_2] : memref<128x32xf32, #tpu.memory_space<vmem>>, vector<128x32xf32>
    %cst = arith.constant dense<0.000000e+00> : vector<8x128xf32>
    %2 = tpu.matmul %0, %1, %cst {dimension_numbers = #tpu.dot_dimension_numbers<[1], [1], [0], [0], [0, 0, 1, 0], [], []>} : vector<8x32xf32>, vector<128x32xf32>, vector<8x128xf32> -> vector<8x128xf32>
    %c0_3 = arith.constant 0 : index
    %c0_4 = arith.constant 0 : index
    %3 = vector.load %arg3[%c0_3, %c0_4] : memref<1x128xf32, #tpu.memory_space<vmem>>, vector<1x128xf32>
    %4 = vector.broadcast %3 : vector<1x128xf32> to vector<8x128xf32>
    %5 = arith.addf %2, %4 : vector<8x128xf32>
    %cst_5 = arith.constant dense<0.000000e+00> : vector<128xf32>
    %6 = vector.multi_reduction <add>, %5, %cst_5 [0] : vector<8x128xf32> to vector<128xf32>
    %7 = vector.shape_cast %6 : vector<128xf32> to vector<1x128xf32>
    %cst_6 = arith.constant 8.000000e+00 : f32
    %8 = vector.broadcast %cst_6 : f32 to vector<1x128xf32>
    %9 = arith.divf %7, %8 : vector<1x128xf32>
    %10 = vector.broadcast %9 : vector<1x128xf32> to vector<8x128xf32>
    %11 = arith.subf %5, %10 : vector<8x128xf32>
    %12 = arith.mulf %11, %11 : vector<8x128xf32>
    %cst_7 = arith.constant dense<0.000000e+00> : vector<128xf32>
    %13 = vector.multi_reduction <add>, %12, %cst_7 [0] : vector<8x128xf32> to vector<128xf32>
    %14 = vector.shape_cast %13 : vector<128xf32> to vector<1x128xf32>
    %cst_8 = arith.constant 8.000000e+00 : f32
    %15 = vector.broadcast %cst_8 : f32 to vector<1x128xf32>
    %16 = arith.divf %14, %15 : vector<1x128xf32>
    %17 = vector.broadcast %9 : vector<1x128xf32> to vector<8x128xf32>
    %18 = arith.subf %5, %17 : vector<8x128xf32>
    %cst_9 = arith.constant 9.99999974E-6 : f32
    %19 = vector.broadcast %cst_9 : f32 to vector<1x128xf32>
    %20 = arith.addf %16, %19 : vector<1x128xf32>
    %21 = math.rsqrt %20 : vector<1x128xf32>
    %22 = vector.broadcast %21 : vector<1x128xf32> to vector<8x128xf32>
    %23 = arith.mulf %18, %22 : vector<8x128xf32>
    %c0_10 = arith.constant 0 : index
    %c0_11 = arith.constant 0 : index
    %24 = vector.load %arg4[%c0_10, %c0_11] : memref<1x128xf32, #tpu.memory_space<vmem>>, vector<1x128xf32>
    %25 = vector.broadcast %24 : vector<1x128xf32> to vector<8x128xf32>
    %26 = arith.mulf %23, %25 : vector<8x128xf32>
    %c0_12 = arith.constant 0 : index
    %c0_13 = arith.constant 0 : index
    %27 = vector.load %arg5[%c0_12, %c0_13] : memref<1x128xf32, #tpu.memory_space<vmem>>, vector<1x128xf32>
    %28 = vector.broadcast %27 : vector<1x128xf32> to vector<8x128xf32>
    %29 = arith.addf %26, %28 : vector<8x128xf32>
    %cst_14 = arith.constant 0.000000e+00 : f32
    %30 = vector.broadcast %cst_14 : f32 to vector<8x128xf32>
    %31 = arith.maximumf %29, %30 : vector<8x128xf32>
    %c0_15 = arith.constant 0 : index
    %c0_16 = arith.constant 0 : index
    %32 = vector.load %arg6[%c0_15, %c0_16] : memref<8x128xf32, #tpu.memory_space<vmem>>, vector<8x128xf32>
    tpu.vector_store %arg6[%c0_15, %c0_16], %31 {strides = array<i32>} : memref<8x128xf32, #tpu.memory_space<vmem>>, vector<8x128xf32>,
    return
  }
  func.func @transform_0(%arg0: i32) -> (i32, i32) {
    %c0_i32 = arith.constant 0 : i32
    %c0_i32_0 = arith.constant 0 : i32
    %c0_i32_1 = arith.constant 0 : i32
    return %c0_i32, %c0_i32_0 : i32, i32
  }
  func.func @transform_1(%arg0: i32) -> (i32, i32) {
    %c0_i32 = arith.constant 0 : i32
    %c0_i32_0 = arith.constant 0 : i32
    return %arg0, %c0_i32 : i32, i32
  }
  func.func @transform_2(%arg0: i32) -> (i32, i32) {
    %c0_i32 = arith.constant 0 : i32
    %c0_i32_0 = arith.constant 0 : i32
    return %c0_i32, %arg0 : i32, i32
  }
  func.func @transform_3(%arg0: i32) -> (i32, i32) {
    %c0_i32 = arith.constant 0 : i32
    %c0_i32_0 = arith.constant 0 : i32
    return %c0_i32, %arg0 : i32, i32
  }
  func.func @transform_4(%arg0: i32) -> (i32, i32) {
    %c0_i32 = arith.constant 0 : i32
    %c0_i32_0 = arith.constant 0 : i32
    return %c0_i32, %arg0 : i32, i32
  }
  func.func @transform_5(%arg0: i32) -> (i32, i32) {
    %c0_i32 = arith.constant 0 : i32
    %c0_i32_0 = arith.constant 0 : i32
    return %c0_i32, %arg0 : i32, i32
  }
}

</mosaic_0001>

<bundles_post_ra>
// kernel: tpu_custom_call.1
= control target key start
LH: loop header
LB: loop body
LE: loop exit
PB: predicated region body
PF: predicated region fallthrough
CT: control target
= control target key end

     0   :  { %vm45_vm0 = vcmask 261120   ;;  %v353_v2 = vmov 0.0|0.0   ;;  %vm354_vm2 = vmmov 0   ;;  %v355_v5 = vmov 0.0   ;;  %s482_s0 = inlined_call_operand.vmem [shape: f32[8,32], index: 0, kind: input, shape index: {}]   ;;  %s483_s1 = inlined_call_operand.vmem [shape: f32[128,32], index: 1, kind: input, shape index: {}]   ;;  %s484_s2 = inlined_call_operand.vmem [shape: f32[1,128], index: 2, kind: input, shape index: {}]   ;;  %s485_s3 = inlined_call_operand.vmem [shape: f32[1,128], index: 3, kind: input, shape index: {}]   ;;  %s486_s4 = inlined_call_operand.vmem [shape: f32[1,128], index: 4, kind: input, shape index: {}]   ;;  %s487_s5 = inlined_call_operand.hbm [shape: f32[8,128], index: 5, kind: output, shape index: {}]  }
   0x1   :  { %v22_v0 = vld [vmem:[%s483_s1] sm:$0xff]  ;;  %v23_v1 = vld [vmem:[%s483_s1 + $0x8] sm:$0xff]  ;;  %291 = vmatprep.subr.bf16.mxu0 %v353_v2  ;;  %vm395_vm1 = vmpackc.low %vm45_vm0, %vm45_vm0  ;;  %288 = vmatprep.mubr.msk.f32.mxu0 %vm354_vm2, %v355_v5 }
   0x2   :  { %v292_v3 = vpack.c.bf16 %v23_v1, %v22_v0  ;;  %v24_v6 = vld [vmem:[%s483_s1 + $0x10] sm:$0xff]  ;;  %v25_v7 = vld [vmem:[%s483_s1 + $0x18] sm:$0xff] }
   0x4   :  { %294 = vmatpush3.bf16.xpose.msk.msra.mxu0 %vm395_vm1, %v292_v3 }
   0x5   :  { %295 = vmatprep.subr.bf16.mxu0 %v353_v2 }
   0x6   :  { %10 = vsyncpa [#allocation3], 0  ;;  %v296_v8 = vpack.c.bf16 %v25_v7, %v24_v6  ;;  %v26_v9 = vld [vmem:[%s483_s1 + $0x20] sm:$0xff]  ;;  %v27_v10 = vld [vmem:[%s483_s1 + $0x28] sm:$0xff]  ;;  %s356_s30 = smov [#allocation2]  }
   0x7   :  { %v300_v11 = vpack.c.bf16 %v27_v10, %v26_v9  ;;  %v28_v12 = vld [vmem:[%s483_s1 + $0x30] sm:$0xff]  ;;  %v29_v13 = vld [vmem:[%s483_s1 + $0x38] sm:$0xff]  ;;  %v30_v15 = vld [vmem:[%s483_s1 + $0x40] sm:$0xff]  ;;  %s211_s6 = sshll.u32 %s356_s30, 4  ;;  %s212_s6 = int_to_ptr.vmem [resolvable:$true] %s211_s6 }
   0x8   :  { %v304_v14 = vpack.c.bf16 %v29_v13, %v28_v12  ;;  %v31_v16 = vld [vmem:[%s483_s1 + $0x48] sm:$0xff]  ;;  %v32_v18 = vld [vmem:[%s483_s1 + $0x50] sm:$0xff]  ;;  %v33_v19 = vld [vmem:[%s483_s1 + $0x58] sm:$0xff]  ;;  %s329_s7 = scalar_lea.vmem %s212_s6, 128  ;;  %p334_p1 = scmp.lt.s32.totalorder %s212_s6, %s212_s6 }
   0x9   :  { %v308_v17 = vpack.c.bf16 %v31_v16, %v30_v15  ;;  %v312_v20 = vpack.c.bf16 %v33_v19, %v32_v18  ;;  %v34_v21 = vld [vmem:[%s483_s1 + $0x60] sm:$0xff]  ;;  %v35_v22 = vld [vmem:[%s483_s1 + $0x68] sm:$0xff]  ;;  %v36_v24 = vld [vmem:[%s483_s1 + $0x70] sm:$0xff]  ;;  %p330_p0 = scmp.ne.s32.totalorder %s212_s6, %s329_s7  ;;  %p335_p2 = scmp.lt.s32.totalorder %s329_s7, %s329_s7 }
   0xa   :  { %v316_v23 = vpack.c.bf16 %v35_v22, %v34_v21  ;;  %v37_v25 = vld [vmem:[%s483_s1 + $0x78] sm:$0xff]  ;;  %v21_v27 = vld [vmem:[%s482_s0] sm:$0xff] }
   0xb   :  { %v320_v26 = vpack.c.bf16 %v37_v25, %v36_v24  ;;  %v219_v28 = vld [vmem:[%s484_s2] ss:$0 sm:$0xff]  ;;  %p336_p3 = por %p335_p2, %p334_p1 }
   0xc   :  { %298 = vmatpush3.bf16.xpose.msk.msra.mxu0 %vm395_vm1, %v296_v8  ;;  %v237_v50 = vld [vmem:[%s485_s3] ss:$0 sm:$0xff] }
   0xd   :  { %299 = vmatprep.subr.bf16.mxu0 %v353_v2  ;;  %v238_v52 = vld [vmem:[%s486_s4] ss:$0 sm:$0xff]  ;;  %p337_p4 = pnand %p336_p3, %p330_p0 }
  0x14   :  { %302 = vmatpush3.bf16.xpose.msk.msra.mxu0 %vm395_vm1, %v300_v11 }
  0x15   :  { %303 = vmatprep.subr.bf16.mxu0 %v353_v2 }
  0x1c   :  { %306 = vmatpush3.bf16.xpose.msk.msra.mxu0 %vm395_vm1, %v304_v14 }
  0x1d   :  { %307 = vmatprep.subr.bf16.mxu0 %v353_v2 }
  0x24   :  { %310 = vmatpush3.bf16.xpose.msk.msra.mxu0 %vm395_vm1, %v308_v17 }
  0x25   :  { %311 = vmatprep.subr.bf16.mxu0 %v353_v2 }
  0x2c   :  { %314 = vmatpush3.bf16.xpose.msk.msra.mxu0 %vm395_vm1, %v312_v20 }
  0x2d   :  { %315 = vmatprep.subr.bf16.mxu0 %v353_v2 }
  0x34   :  { %318 = vmatpush3.bf16.xpose.msk.msra.mxu0 %vm395_vm1, %v316_v23 }
  0x35   :  { %319 = vmatprep.subr.bf16.mxu0 %v353_v2 }
  0x3c   :  { %322 = vmatpush3.bf16.xpose.msk.msra.mxu0 %vm395_vm1, %v320_v26 }
  0x43   :  { %289 = vmatmul.mubr.msk.f32.vlgmr.msra.gmra.mrb[0].mxu0 %vm45_vm0, %v21_v27 }
 0x116   :  { %v163_v29 = vpop.f32.mrb[0].mxu0 }
 0x117   :  { %v164_v30 = vadd.f32 %v219_v28, %v163_v29  ;;  %v290_v31 = vpop.f32.mrb[1].mxu0 }
 0x119   :  { %v167_v32 = vrot.slane %v164_v30, 4 }
 0x11b   :  { %v168_v33 = vadd.f32 %v167_v32, %v164_v30 }
 0x11d   :  { %v169_v34 = vrot.slane %v168_v33, 2 }
 0x11f   :  { %v170_v35 = vadd.f32 %v169_v34, %v168_v33 }
 0x121   :  { %v171_v36 = vrot.slane %v170_v35, 1 }
 0x123   :  { %v172_v37 = vadd.f32 %v171_v36, %v170_v35 }
 0x125   :  { %v174_v38 = vmul.f32 0.125, %v172_v37 }
 0x127   :  { %v175_v39 = vsub.f32 %v164_v30, %v174_v38 }
 0x129   :  { %v176_v40 = vmul.f32 %v175_v39, %v175_v39 }
 0x12b   :  { %v177_v41 = vrot.slane %v176_v40, 4 }
 0x12d   :  { %v178_v42 = vadd.f32 %v177_v41, %v176_v40 }
 0x12f   :  { %v179_v43 = vrot.slane %v178_v42, 2 }
 0x131   :  { %v180_v44 = vadd.f32 %v179_v43, %v178_v42 }
 0x133   :  { %v181_v45 = vrot.slane %v180_v44, 1 }
 0x135   :  { %v182_v46 = vadd.f32 %v181_v45, %v180_v44 }
 0x137   :  { %v183_v47 = vmul.f32 0.125, %v182_v46 }
 0x139   :  { %v184_v48 = vadd.f32 1e-05, %v183_v47 }
 0x13b   :  { %327 = vrsqrt.f32 %v184_v48 }
 0x145   :  { %v328_v49 = vpop.eup %327 }
 0x146   :  { %v186_v51 = vmul.f32 %v328_v49, %v175_v39 }
 0x148   :  { %v194_v53 = vmul.f32 %v237_v50, %v186_v51 }
 0x14a   :  { %v202_v54 = vadd.f32 %v238_v52, %v194_v53 }
 0x14c   :  { %v203_v55 = vmax.f32 %v202_v54, 0.0 }
 0x14e   :  { %204 = vst [vmem:[#allocation2] sm:$0xff] %v203_v55 }
 0x14f   :  { %340 = shalt.err (!%p337_p4)
}
 0x150   :  { %s341_s9 = scalar_lea.hbm %s487_s5, 128 }
 0x151   :  { %p342_p5 = scmp.ne.s32.totalorder %s487_s5, %s341_s9  ;;  %p345_p6 = scmp.lt.u32.totalorder %s341_s9, %s487_s5 }
 0x153   :  { %p347_p7 = pnand %p345_p6, %p342_p5 }
 0x155   :  { %350 = shalt.err (!%p347_p7)
}
 0x156   :  { %214 = dma.vmem_to_hbm [thread:$0]  %s212_s6, 128, %s487_s5, [#allocation3]  }
 0x157   :  { %351 = dma.done.wait [#allocation3], 128  }
 0x158   :  { %352 = vsyncadd [#allocation3], 4294967168 }
 0x159   :  { %218 = vsyncpa [#allocation3], 1 }

</bundles_post_ra>
